<compile_context>
chip_gen: v7x
topology: tpu7x:2x2x1
jax: 0.10.0
libtpu: 0.0.40
codegen_flags: <defaults>
</compile_context>

<pallas_src>
import jax
import jax.numpy as jnp
from jax.experimental import pallas as pl
from jax.experimental.pallas import tpu as pltpu


def _round_up(x, m):
    return ((x + m - 1) // m) * m


def _make_neumf_kernel(n_fc_layers):
    """Kernel for a fixed number of FC layers (feature-major layout).

    Ref order:
      u_mlp (d_mlp, TB), i_mlp (d_mlp, TB), u_mf (d_mf, TB), i_mf (d_mf, TB),
      W1_u (out1, d_mlp), W1_i (out1, d_mlp), b1 (out1, 1),
      (W_l (out, in), b_l (out, 1)) * (n_fc_layers - 1),
      wa_mlp (layers[-1], 1), wa_mf (d_mf, 1), b_aff (1, 1) [SMEM],
      out (1, TB)
    """
    assert n_fc_layers >= 1

    def kernel(*refs):
        u_mlp = refs[0][...]
        i_mlp = refs[1][...]
        u_mf = refs[2][...]
        i_mf = refs[3][...]
        idx = 4

        # First FC layer with the concat fused away via a split weight:
        #   relu(W1 @ concat(u, i) + b1) == relu(W1_u @ u + W1_i @ i + b1)
        w1_u = refs[idx][...]
        w1_i = refs[idx + 1][...]
        b1 = refs[idx + 2][...]
        idx += 3
        h = (jnp.dot(w1_u, u_mlp, preferred_element_type=jnp.float32)
             + jnp.dot(w1_i, i_mlp, preferred_element_type=jnp.float32)
             + b1)
        h = jnp.maximum(h, 0.0)

        for _ in range(n_fc_layers - 1):
            w = refs[idx][...]
            b = refs[idx + 1][...]
            idx += 2
            h = jnp.dot(w, h, preferred_element_type=jnp.float32) + b
            h = jnp.maximum(h, 0.0)

        wa_mlp = refs[idx][...]       # (layers[-1], 1)
        wa_mf = refs[idx + 1][...]    # (d_mf, 1)
        b_aff_ref = refs[idx + 2]     # (1, 1) scalar in SMEM
        out_ref = refs[idx + 3]       # (1, TB)

        # GMF path fused in-kernel (free VPU elementwise once tiles are in VMEM).
        mf = u_mf.astype(jnp.float32) * i_mf.astype(jnp.float32)

        # Final affine over concat([h, mf]) as broadcast-mul + sublane reduce
        # (VPU + XLU) instead of two N=1 MXU dots; lane-dense (1, TB) result.
        logits = (jnp.sum(wa_mlp * h, axis=0, keepdims=True)
                  + jnp.sum(wa_mf * mf, axis=0, keepdims=True)
                  + b_aff_ref[0, 0])
        out_ref[...] = jax.nn.sigmoid(logits)

    return kernel


def neumf_forward(user_indices, item_indices, params, *,
                  block_batch=1024, activation_dtype=jnp.float32):
    """NeuMF forward. Returns rating of shape (B,) in float32."""
    emb_u_mlp = params["emb_user_mlp"]
    emb_i_mlp = params["emb_item_mlp"]
    emb_u_mf = params["emb_user_mf"]
    emb_i_mf = params["emb_item_mf"]
    d_mlp = emb_u_mlp.shape[1]
    d_mf = emb_u_mf.shape[1]

    fc_ws = params["fc_ws"]        # list of (out, in)  -- PyTorch orientation
    fc_bs = params["fc_bs"]        # list of (out, 1)
    wa_mlp = params["aff_w_mlp"]   # (layers[-1], 1)
    wa_mf = params["aff_w_mf"]     # (d_mf, 1)
    b_aff = params["aff_b"]        # (1, 1)
    n_fc = len(fc_ws)

    B = int(user_indices.shape[0])
    TB = min(block_batch, _round_up(max(B, 1), 128))
    B_pad = _round_up(B, TB)
    if B_pad != B:
        pad = B_pad - B
        user_idx = jnp.concatenate(
            [user_indices, jnp.zeros((pad,), user_indices.dtype)])
        item_idx = jnp.concatenate(
            [item_indices, jnp.zeros((pad,), item_indices.dtype)])
    else:
        user_idx, item_idx = user_indices, item_indices

    # Glue: embedding gathers, emitted feature-major (D, B_pad) so the batch
    # lands on the 128-lane axis inside the kernel.
    u_mlp = emb_u_mlp[user_idx].astype(activation_dtype).T
    i_mlp = emb_i_mlp[item_idx].astype(activation_dtype).T
    u_mf = emb_u_mf[user_idx].astype(activation_dtype).T
    i_mf = emb_i_mf[item_idx].astype(activation_dtype).T

    # First FC weight split so the kernel never needs a lane-dim concatenate.
    w1 = fc_ws[0]
    w1_u, w1_i = w1[:, :d_mlp], w1[:, d_mlp:]

    inputs = [u_mlp, i_mlp, u_mf, i_mf, w1_u, w1_i, fc_bs[0]]
    for w, b in zip(fc_ws[1:], fc_bs[1:]):
        inputs += [w, b]
    inputs += [wa_mlp, wa_mf, b_aff]

    def act_spec(d):
        return pl.BlockSpec((d, TB), lambda i: (0, i))

    def resident_spec(arr):
        # Whole (tiny) weight resident in VMEM across every grid step.
        return pl.BlockSpec(arr.shape, lambda i: (0, 0))

    in_specs = [act_spec(d_mlp), act_spec(d_mlp), act_spec(d_mf), act_spec(d_mf)]
    in_specs += [resident_spec(a) for a in inputs[4:-1]]
    # scalar affine bias lives in SMEM, off the vector-load path
    in_specs += [pl.BlockSpec(memory_space=pltpu.MemorySpace.SMEM)]

    out_spec = pl.BlockSpec((1, TB), lambda i: (0, i))

    # Advisory cost estimate for XLA's scheduler around the surrounding gathers.
    flops_per_row = 2 * (2 * d_mlp) * fc_ws[0].shape[0]
    for w in fc_ws[1:]:
        flops_per_row += 2 * w.shape[0] * w.shape[1]
    flops_per_row += d_mf + 2 * (fc_ws[-1].shape[0] + d_mf)
    act_bytes = (2 * d_mlp + 2 * d_mf) * B_pad * jnp.dtype(activation_dtype).itemsize
    w_bytes = sum(int(a.size) * a.dtype.itemsize for a in inputs[4:])
    cost = pl.CostEstimate(
        flops=int(flops_per_row) * B_pad,
        transcendentals=B_pad,
        bytes_accessed=int(act_bytes + w_bytes + B_pad * 4),
    )

    kernel = _make_neumf_kernel(n_fc)

    out = pl.pallas_call(
        kernel,
        out_shape=jax.ShapeDtypeStruct((1, B_pad), jnp.float32),
        grid=(B_pad // TB,),
        in_specs=in_specs,
        out_specs=out_spec,
        compiler_params=pltpu.CompilerParams(
            dimension_semantics=("parallel",),
            vmem_limit_bytes=32 * 1024 * 1024,
        ),
        cost_estimate=cost,
    )(*inputs)

    # Padded batch rows (if any) carry harmless garbage and are dropped here.
    return out[0, :B]


def init_params(key, num_users, num_items, latent_dim_mf, latent_dim_mlp, layers):
    """Deterministic parameter init (shapes match the PyTorch module)."""
    n_keys = 4 + 2 * (len(layers) - 1) + 2
    keys = jax.random.split(key, n_keys)
    k = iter(keys)

    def normal(kk, shape, scale=0.05):
        return (scale * jax.random.normal(kk, shape)).astype(jnp.float32)

    params = {
        "emb_user_mlp": normal(next(k), (num_users, latent_dim_mlp)),
        "emb_item_mlp": normal(next(k), (num_items, latent_dim_mlp)),
        "emb_user_mf": normal(next(k), (num_users, latent_dim_mf)),
        "emb_item_mf": normal(next(k), (num_items, latent_dim_mf)),
    }

    fc_ws, fc_bs = [], []
    for in_size, out_size in zip(layers[:-1], layers[1:]):
        scale = 1.0 / float(in_size) ** 0.5
        # PyTorch Linear orientation: weight (out, in); bias stored as (out, 1).
        fc_ws.append(normal(next(k), (out_size, in_size), scale=scale))
        fc_bs.append(normal(next(k), (out_size, 1), scale=scale))
    params["fc_ws"] = fc_ws
    params["fc_bs"] = fc_bs

    aff_in = layers[-1] + latent_dim_mf
    scale = 1.0 / float(aff_in) ** 0.5
    aff_w = normal(next(k), (aff_in, 1), scale=scale)    # column vector
    params["aff_w_mlp"] = aff_w[: layers[-1], :]
    params["aff_w_mf"] = aff_w[layers[-1]:, :]
    params["aff_b"] = normal(next(k), (1, 1), scale=scale)
    return params


if __name__ == "__main__":
    # Small, self-consistent config: layers[0] must equal 2 * latent_dim_mlp.
    num_users = 32
    num_items = 48
    latent_dim_mf = 8
    latent_dim_mlp = 8
    layers = [16, 32, 16, 8]
    batch = 8

    root = jax.random.PRNGKey(0)
    k_param, k_u, k_i = jax.random.split(root, 3)

    params = init_params(k_param, num_users, num_items,
                         latent_dim_mf, latent_dim_mlp, layers)

    user_indices = jax.random.randint(k_u, (batch,), 0, num_users, dtype=jnp.int32)
    item_indices = jax.random.randint(k_i, (batch,), 0, num_items, dtype=jnp.int32)

    rating = neumf_forward(user_indices, item_indices, params)
    rating = jax.block_until_ready(rating)

    # quick sanity check against a pure-JAX reference (PyTorch semantics)
    def ref_forward(u, i, p):
        mlp = jnp.concatenate([p["emb_user_mlp"][u], p["emb_item_mlp"][i]], axis=-1)
        mf = p["emb_user_mf"][u] * p["emb_item_mf"][i]
        h = mlp
        for w, b in zip(p["fc_ws"], p["fc_bs"]):
            h = jnp.maximum(h @ w.T + b.reshape(1, -1), 0.0)
        vec = jnp.concatenate([h, mf], axis=-1)
        wa = jnp.concatenate([p["aff_w_mlp"], p["aff_w_mf"]], axis=0)
        logits = vec @ wa + p["aff_b"][0, 0]
        return jax.nn.sigmoid(logits).reshape(-1)

    ref = ref_forward(user_indices, item_indices, params)
    assert rating.shape == (batch,)
    assert jnp.allclose(rating, ref, atol=1e-5), (rating, ref)

    print("KERNEL_OK")
</pallas_src>

<mosaic_0001>
module attributes {stable_mosaic.version = 11 : i64} {
  func.func @kernel(%arg0: i32, %arg1: memref<8x128xf32, #tpu.memory_space<vmem>>, %arg2: memref<8x128xf32, #tpu.memory_space<vmem>>, %arg3: memref<8x128xf32, #tpu.memory_space<vmem>>, %arg4: memref<8x128xf32, #tpu.memory_space<vmem>>, %arg5: memref<32x8xf32, #tpu.memory_space<vmem>>, %arg6: memref<32x8xf32, #tpu.memory_space<vmem>>, %arg7: memref<32x1xf32, #tpu.memory_space<vmem>>, %arg8: memref<16x32xf32, #tpu.memory_space<vmem>>, %arg9: memref<16x1xf32, #tpu.memory_space<vmem>>, %arg10: memref<8x16xf32, #tpu.memory_space<vmem>>, %arg11: memref<8x1xf32, #tpu.memory_space<vmem>>, %arg12: memref<8x1xf32, #tpu.memory_space<vmem>>, %arg13: memref<8x1xf32, #tpu.memory_space<vmem>>, %arg14: memref<1x1xf32, #tpu.memory_space<smem>>, %arg15: memref<1x128xf32, #tpu.memory_space<vmem>>) attributes {dimension_semantics = [#tpu.dimension_semantics<parallel>], iteration_bounds = array<i64: 1>, scalar_prefetch = 0 : i64, scratch_operands = 0 : i64, tpu.core_type = #tpu.core_type<tc>, window_params = [{transform_indices = @transform_0, window_bounds = array<i64: 8, 128>}, {transform_indices = @transform_1, window_bounds = array<i64: 8, 128>}, {transform_indices = @transform_2, window_bounds = array<i64: 8, 128>}, {transform_indices = @transform_3, window_bounds = array<i64: 8, 128>}, {pipeline_mode = #tpu.pipeline_mode<synchronous>, transform_indices = @transform_4, window_bounds = array<i64: 32, 8>}, {pipeline_mode = #tpu.pipeline_mode<synchronous>, transform_indices = @transform_5, window_bounds = array<i64: 32, 8>}, {pipeline_mode = #tpu.pipeline_mode<synchronous>, transform_indices = @transform_6, window_bounds = array<i64: 32, 1>}, {pipeline_mode = #tpu.pipeline_mode<synchronous>, transform_indices = @transform_7, window_bounds = array<i64: 16, 32>}, {pipeline_mode = #tpu.pipeline_mode<synchronous>, transform_indices = @transform_8, window_bounds = array<i64: 16, 1>}, {pipeline_mode = #tpu.pipeline_mode<synchronous>, transform_indices = @transform_9, window_bounds = array<i64: 8, 16>}, {pipeline_mode = #tpu.pipeline_mode<synchronous>, transform_indices = @transform_10, window_bounds = array<i64: 8, 1>}, {pipeline_mode = #tpu.pipeline_mode<synchronous>, transform_indices = @transform_11, window_bounds = array<i64: 8, 1>}, {pipeline_mode = #tpu.pipeline_mode<synchronous>, transform_indices = @transform_12, window_bounds = array<i64: 8, 1>}, {transform_indices = @transform_13, window_bounds = array<i64: 1, 1>}, {transform_indices = @transform_14, window_bounds = array<i64: 1, 128>}]} {
    %c0 = arith.constant 0 : index
    %c0_0 = arith.constant 0 : index
    %0 = vector.load %arg1[%c0, %c0_0] : memref<8x128xf32, #tpu.memory_space<vmem>>, vector<8x128xf32>
    %c0_1 = arith.constant 0 : index
    %c0_2 = arith.constant 0 : index
    %1 = vector.load %arg2[%c0_1, %c0_2] : memref<8x128xf32, #tpu.memory_space<vmem>>, vector<8x128xf32>
    %c0_3 = arith.constant 0 : index
    %c0_4 = arith.constant 0 : index
    %2 = vector.load %arg3[%c0_3, %c0_4] : memref<8x128xf32, #tpu.memory_space<vmem>>, vector<8x128xf32>
    %c0_5 = arith.constant 0 : index
    %c0_6 = arith.constant 0 : index
    %3 = vector.load %arg4[%c0_5, %c0_6] : memref<8x128xf32, #tpu.memory_space<vmem>>, vector<8x128xf32>
    %c0_7 = arith.constant 0 : index
    %c0_8 = arith.constant 0 : index
    %4 = vector.load %arg5[%c0_7, %c0_8] : memref<32x8xf32, #tpu.memory_space<vmem>>, vector<32x8xf32>
    %c0_9 = arith.constant 0 : index
    %c0_10 = arith.constant 0 : index
    %5 = vector.load %arg6[%c0_9, %c0_10] : memref<32x8xf32, #tpu.memory_space<vmem>>, vector<32x8xf32>
    %c0_11 = arith.constant 0 : index
    %c0_12 = arith.constant 0 : index
    %6 = vector.load %arg7[%c0_11, %c0_12] : memref<32x1xf32, #tpu.memory_space<vmem>>, vector<32x1xf32>
    %cst = arith.constant dense<0.000000e+00> : vector<32x128xf32>
    %7 = tpu.matmul %4, %0, %cst {dimension_numbers = #tpu.dot_dimension_numbers<[1], [0], [0], [1], [0, 0, 1, 1], [], []>} : vector<32x8xf32>, vector<8x128xf32>, vector<32x128xf32> -> vector<32x128xf32>
    %cst_13 = arith.constant dense<0.000000e+00> : vector<32x128xf32>
    %8 = tpu.matmul %5, %1, %cst_13 {dimension_numbers = #tpu.dot_dimension_numbers<[1], [0], [0], [1], [0, 0, 1, 1], [], []>} : vector<32x8xf32>, vector<8x128xf32>, vector<32x128xf32> -> vector<32x128xf32>
    %9 = arith.addf %7, %8 : vector<32x128xf32>
    %10 = vector.broadcast %6 : vector<32x1xf32> to vector<32x128xf32>
    %11 = arith.addf %9, %10 : vector<32x128xf32>
    %cst_14 = arith.constant 0.000000e+00 : f32
    %12 = vector.broadcast %cst_14 : f32 to vector<32x128xf32>
    %13 = arith.maximumf %11, %12 : vector<32x128xf32>
    %c0_15 = arith.constant 0 : index
    %c0_16 = arith.constant 0 : index
    %14 = vector.load %arg8[%c0_15, %c0_16] : memref<16x32xf32, #tpu.memory_space<vmem>>, vector<16x32xf32>
    %c0_17 = arith.constant 0 : index
    %c0_18 = arith.constant 0 : index
    %15 = vector.load %arg9[%c0_17, %c0_18] : memref<16x1xf32, #tpu.memory_space<vmem>>, vector<16x1xf32>
    %cst_19 = arith.constant dense<0.000000e+00> : vector<16x128xf32>
    %16 = tpu.matmul %14, %13, %cst_19 {dimension_numbers = #tpu.dot_dimension_numbers<[1], [0], [0], [1], [0, 0, 1, 1], [], []>} : vector<16x32xf32>, vector<32x128xf32>, vector<16x128xf32> -> vector<16x128xf32>
    %17 = vector.broadcast %15 : vector<16x1xf32> to vector<16x128xf32>
    %18 = arith.addf %16, %17 : vector<16x128xf32>
    %cst_20 = arith.constant 0.000000e+00 : f32
    %19 = vector.broadcast %cst_20 : f32 to vector<16x128xf32>
    %20 = arith.maximumf %18, %19 : vector<16x128xf32>
    %c0_21 = arith.constant 0 : index
    %c0_22 = arith.constant 0 : index
    %21 = vector.load %arg10[%c0_21, %c0_22] : memref<8x16xf32, #tpu.memory_space<vmem>>, vector<8x16xf32>
    %c0_23 = arith.constant 0 : index
    %c0_24 = arith.constant 0 : index
    %22 = vector.load %arg11[%c0_23, %c0_24] : memref<8x1xf32, #tpu.memory_space<vmem>>, vector<8x1xf32>
    %cst_25 = arith.constant dense<0.000000e+00> : vector<8x128xf32>
    %23 = tpu.matmul %21, %20, %cst_25 {dimension_numbers = #tpu.dot_dimension_numbers<[1], [0], [0], [1], [0, 0, 1, 1], [], []>} : vector<8x16xf32>, vector<16x128xf32>, vector<8x128xf32> -> vector<8x128xf32>
    %24 = vector.broadcast %22 : vector<8x1xf32> to vector<8x128xf32>
    %25 = arith.addf %23, %24 : vector<8x128xf32>
    %cst_26 = arith.constant 0.000000e+00 : f32
    %26 = vector.broadcast %cst_26 : f32 to vector<8x128xf32>
    %27 = arith.maximumf %25, %26 : vector<8x128xf32>
    %c0_27 = arith.constant 0 : index
    %c0_28 = arith.constant 0 : index
    %28 = vector.load %arg12[%c0_27, %c0_28] : memref<8x1xf32, #tpu.memory_space<vmem>>, vector<8x1xf32>
    %c0_29 = arith.constant 0 : index
    %c0_30 = arith.constant 0 : index
    %29 = vector.load %arg13[%c0_29, %c0_30] : memref<8x1xf32, #tpu.memory_space<vmem>>, vector<8x1xf32>
    %30 = arith.mulf %2, %3 : vector<8x128xf32>
    %31 = vector.broadcast %28 : vector<8x1xf32> to vector<8x128xf32>
    %32 = arith.mulf %31, %27 : vector<8x128xf32>
    %cst_31 = arith.constant dense<0.000000e+00> : vector<128xf32>
    %33 = vector.multi_reduction <add>, %32, %cst_31 [0] : vector<8x128xf32> to vector<128xf32>
    %34 = vector.shape_cast %33 : vector<128xf32> to vector<1x128xf32>
    %35 = vector.broadcast %29 : vector<8x1xf32> to vector<8x128xf32>
    %36 = arith.mulf %35, %30 : vector<8x128xf32>
    %cst_32 = arith.constant dense<0.000000e+00> : vector<128xf32>
    %37 = vector.multi_reduction <add>, %36, %cst_32 [0] : vector<8x128xf32> to vector<128xf32>
    %38 = vector.shape_cast %37 : vector<128xf32> to vector<1x128xf32>
    %39 = arith.addf %34, %38 : vector<1x128xf32>
    %c0_33 = arith.constant 0 : index
    %c0_34 = arith.constant 0 : index
    %40 = memref.load %arg14[%c0_33, %c0_34] : memref<1x1xf32, #tpu.memory_space<smem>>
    %41 = vector.broadcast %40 : f32 to vector<1x128xf32>
    %42 = arith.addf %39, %41 : vector<1x128xf32>
    %43 = arith.negf %42 : vector<1x128xf32>
    %44 = math.exp %43 : vector<1x128xf32>
    %cst_35 = arith.constant 1.000000e+00 : f32
    %45 = vector.broadcast %cst_35 : f32 to vector<1x128xf32>
    %46 = arith.addf %45, %44 : vector<1x128xf32>
    %47 = arith.divf %45, %46 : vector<1x128xf32>
    %c0_36 = arith.constant 0 : index
    %c0_37 = arith.constant 0 : index
    %48 = vector.load %arg15[%c0_36, %c0_37] : memref<1x128xf32, #tpu.memory_space<vmem>>, vector<1x128xf32>
    tpu.vector_store %arg15[%c0_36, %c0_37], %47 {strides = array<i32>} : memref<1x128xf32, #tpu.memory_space<vmem>>, vector<1x128xf32>,
    return
  }
  func.func @transform_0(%arg0: i32) -> (i32, i32) {
    %c0_i32 = arith.constant 0 : i32
    %c0_i32_0 = arith.constant 0 : i32
    return %c0_i32, %arg0 : i32, i32
  }
  func.func @transform_1(%arg0: i32) -> (i32, i32) {
    %c0_i32 = arith.constant 0 : i32
    %c0_i32_0 = arith.constant 0 : i32
    return %c0_i32, %arg0 : i32, i32
  }
  func.func @transform_2(%arg0: i32) -> (i32, i32) {
    %c0_i32 = arith.constant 0 : i32
    %c0_i32_0 = arith.constant 0 : i32
    return %c0_i32, %arg0 : i32, i32
  }
  func.func @transform_3(%arg0: i32) -> (i32, i32) {
    %c0_i32 = arith.constant 0 : i32
    %c0_i32_0 = arith.constant 0 : i32
    return %c0_i32, %arg0 : i32, i32
  }
  func.func @transform_4(%arg0: i32) -> (i32, i32) {
    %c0_i32 = arith.constant 0 : i32
    %c0_i32_0 = arith.constant 0 : i32
    %c0_i32_1 = arith.constant 0 : i32
    return %c0_i32, %c0_i32_0 : i32, i32
  }
  func.func @transform_5(%arg0: i32) -> (i32, i32) {
    %c0_i32 = arith.constant 0 : i32
    %c0_i32_0 = arith.constant 0 : i32
    %c0_i32_1 = arith.constant 0 : i32
    return %c0_i32, %c0_i32_0 : i32, i32
  }
  func.func @transform_6(%arg0: i32) -> (i32, i32) {
    %c0_i32 = arith.constant 0 : i32
    %c0_i32_0 = arith.constant 0 : i32
    %c0_i32_1 = arith.constant 0 : i32
    return %c0_i32, %c0_i32_0 : i32, i32
  }
  func.func @transform_7(%arg0: i32) -> (i32, i32) {
    %c0_i32 = arith.constant 0 : i32
    %c0_i32_0 = arith.constant 0 : i32
    %c0_i32_1 = arith.constant 0 : i32
    return %c0_i32, %c0_i32_0 : i32, i32
  }
  func.func @transform_8(%arg0: i32) -> (i32, i32) {
    %c0_i32 = arith.constant 0 : i32
    %c0_i32_0 = arith.constant 0 : i32
    %c0_i32_1 = arith.constant 0 : i32
    return %c0_i32, %c0_i32_0 : i32, i32
  }
  func.func @transform_9(%arg0: i32) -> (i32, i32) {
    %c0_i32 = arith.constant 0 : i32
    %c0_i32_0 = arith.constant 0 : i32
    %c0_i32_1 = arith.constant 0 : i32
    return %c0_i32, %c0_i32_0 : i32, i32
  }
  func.func @transform_10(%arg0: i32) -> (i32, i32) {
    %c0_i32 = arith.constant 0 : i32
    %c0_i32_0 = arith.constant 0 : i32
    %c0_i32_1 = arith.constant 0 : i32
    return %c0_i32, %c0_i32_0 : i32, i32
  }
  func.func @transform_11(%arg0: i32) -> (i32, i32) {
    %c0_i32 = arith.constant 0 : i32
    %c0_i32_0 = arith.constant 0 : i32
    %c0_i32_1 = arith.constant 0 : i32
    return %c0_i32, %c0_i32_0 : i32, i32
  }
  func.func @transform_12(%arg0: i32) -> (i32, i32) {
    %c0_i32 = arith.constant 0 : i32
    %c0_i32_0 = arith.constant 0 : i32
    %c0_i32_1 = arith.constant 0 : i32
    return %c0_i32, %c0_i32_0 : i32, i32
  }
  func.func @transform_13(%arg0: i32) -> (i32, i32) {
    %c0_i32 = arith.constant 0 : i32
    %c0_i32_0 = arith.constant 0 : i32
    %c0_i32_1 = arith.constant 0 : i32
    return %c0_i32, %c0_i32_0 : i32, i32
  }
  func.func @transform_14(%arg0: i32) -> (i32, i32) {
    %c0_i32 = arith.constant 0 : i32
    %c0_i32_0 = arith.constant 0 : i32
    return %c0_i32, %arg0 : i32, i32
  }
}

</mosaic_0001>

<bundles_post_ra>
// kernel: tpu_custom_call.1
= control target key start
LH: loop header
LB: loop body
LE: loop exit
PB: predicated region body
PF: predicated region fallthrough
CT: control target
= control target key end

     0   :  { %vm65_vm0 = vcmask 64512   ;;  %v635_v5 = vmov 0   ;;  %s812_s0 = inlined_call_operand.vmem [shape: f32[8,128], index: 0, kind: input, shape index: {}]   ;;  %s813_s1 = inlined_call_operand.vmem [shape: f32[8,128], index: 1, kind: input, shape index: {}]   ;;  %s814_s2 = inlined_call_operand.vmem [shape: f32[8,128], index: 2, kind: input, shape index: {}]   ;;  %s815_s3 = inlined_call_operand.vmem [shape: f32[8,128], index: 3, kind: input, shape index: {}]   ;;  %s816_s4 = inlined_call_operand.vmem [shape: f32[32,8], index: 4, kind: input, shape index: {}]   ;;  %s817_s5 = inlined_call_operand.vmem [shape: f32[32,8], index: 5, kind: input, shape index: {}]   ;;  %s818_s6 = inlined_call_operand.vmem [shape: f32[32,1], index: 6, kind: input, shape index: {}]   ;;  %s819_s7 = inlined_call_operand.vmem [shape: f32[16,32], index: 7, kind: input, shape index: {}]   ;;  %s820_s8 = inlined_call_operand.vmem [shape: f32[16,1], index: 8, kind: input, shape index: {}]   ;;  %s821_s9 = inlined_call_operand.vmem [shape: f32[8,16], index: 9, kind: input, shape index: {}]   ;;  %s822_s10 = inlined_call_operand.vmem [shape: f32[8,1], index: 10, kind: input, shape index: {}]   ;;  %s823_s11 = inlined_call_operand.vmem [shape: f32[8,1], index: 11, kind: input, shape index: {}]   ;;  %s824_s12 = inlined_call_operand.vmem [shape: f32[8,1], index: 12, kind: input, shape index: {}]   ;;  %s825_s13 = inlined_call_operand.<no memory space> [shape: f32[1,1], index: 13, kind: input, shape index: {}]   ;;  %s826_s14 = inlined_call_operand.hbm [shape: f32[1,128], index: 14, kind: output, shape index: {}]  }
   0x1   :  { %v50_v0 = vld [vmem:[%s813_s1] sm:$0xff]  ;;  %v58_v2 = vld [vmem:[%s817_s5 + $0x8] sm:$0xff]  ;;  %v59_v4 = vld [vmem:[%s817_s5 + $0x10] sm:$0xff]  ;;  %605 = vset.pattern.permute.xlu0 %v635_v5  ;;  %606 = vset.pattern.permute.xlu1 %v635_v5 }
   0x2   :  { %v57_v1 = vld [vmem:[%s817_s5] sm:$0xff]  ;;  %551 = vmatprep.subr.mxu0 %v50_v0  ;;  %v60_v7 = vld [vmem:[%s817_s5 + $0x18] sm:$0xff]  ;;  %v63_v8 = vld [vmem:[%s818_s6 + $0x10] sm:$0xff] }
   0x3   :  { %553 = vmatprep.mubr.msk.f32.mxu0 %vm65_vm0, %v57_v1  ;;  %v49_v3 = vld [vmem:[%s812_s0] sm:$0xff]  ;;  %552 = vmatpush3.msra.mxu0 %v50_v0  ;;  %v62_v10 = vld [vmem:[%s818_s6 + $0x8] sm:$0xff] }
   0x4   :  { %554 = vmatmul.mubr.msk.f32.vlgmr.msra.gmra.mrb[0].mxu0 %vm65_vm0, %v58_v2  ;;  %559 = vmatprep.subr.mxu0 %v49_v3  ;;  %v61_v6 = vld [vmem:[%s818_s6] sm:$0xff] }
   0x5   :  { %560 = vmatpush3.msra.mxu0 %v49_v3  ;;  %556 = vmatprep.mubr.msk.f32.mxu0 %vm65_vm0, %v59_v4  ;;  %v53_v9 = vld [vmem:[%s816_s4] sm:$0xff] }
   0x6   :  { %262 = vperm.xlu0 %605, %v61_v6   ;;  %272 = vperm.xlu1 %606, %v63_v8  }
   0x7   :  { %20 = vsyncpa [#allocation4], 0  ;;  %v64_v11 = vld [vmem:[%s818_s6 + $0x18] sm:$0xff]  ;;  %v54_v12 = vld [vmem:[%s816_s4 + $0x8] sm:$0xff]  ;;  %vm302_vm1 = vcmask 261120   ;;  %v636_v40 = vmov 0.0|0.0  }
   0x8   :  { %557 = vmatmul.mubr.msk.f32.gmra.mrb[2].mxu0 %vm65_vm0, %v60_v7  ;;  %v55_v13 = vld [vmem:[%s816_s4 + $0x10] sm:$0xff]  ;;  %v290_v14 = vld [vmem:[%s820_s8] sm:$0xff]  ;;  %v291_v15 = vld [vmem:[%s820_s8 + $0x8] sm:$0xff]  ;;  %vm637_vm2 = vmmov 0   ;;  %v638_v41 = vmov 0.0   ;;  %vm393_vm3 = vcmask 130048  }
   0x9   :  { %561 = vmatprep.mubr.msk.f32.mxu0 %vm65_vm0, %v53_v9  ;;  %v56_v16 = vld [vmem:[%s816_s4 + $0x18] sm:$0xff]  ;;  %v387_v17 = vld [vmem:[%s822_s10] sm:$0xff]  ;;  %v289_v39 = vld [vmem:[%s819_s7 + $0x8] sm:$0xff] }
   0xa   :  { %267 = vperm.xlu0 %605, %v62_v10   ;;  %277 = vperm.xlu1 %606, %v64_v11   ;;  %v468_v18 = vld [vmem:[%s823_s11] sm:$0xff] }
   0xb   :  { %v469_v19 = vld [vmem:[%s824_s12] sm:$0xff] }
   0xc   :  { %562 = vmatmul.mubr.msk.f32.vlgmr.msra.gmra.mrb[0].mxu0 %vm65_vm0, %v54_v12  ;;  %v288_v20 = vld [vmem:[%s819_s7] sm:$0xff]  ;;  %v497_v12 = vstv %s825_s13 }
   0xd   :  { %564 = vmatprep.mubr.msk.f32.mxu0 %vm65_vm0, %v55_v13  ;;  %575 = vmatprep.mubr.msk.f32.mxu1 %vm302_vm1, %v288_v20  ;;  %v386_v51 = vld [vmem:[%s821_s9] sm:$0xff]  ;;  %s639_s9 = smov [#allocation3]  }
   0xe   :  { %294 = vperm.xlu0 %605, %v290_v14   ;;  %299 = vperm.xlu1 %606, %v291_v15   ;;  %v51_v53 = vld [vmem:[%s814_s2] sm:$0xff]  ;;  %s512_s16 = sshll.u32 %s639_s9, 4  ;;  %s513_s16 = int_to_ptr.vmem [resolvable:$true] %s512_s16 }
   0xf   :  { %v52_v54 = vld [vmem:[%s815_s3] sm:$0xff]  ;;  %s611_s17 = scalar_lea.vmem %s513_s16, 16  ;;  %s615_s18 = scalar_lea.vmem %s513_s16, 32 }
  0x10   :  { %565 = vmatmul.mubr.msk.f32.gmra.mrb[2].mxu0 %vm65_vm0, %v56_v16  ;;  %v470_v55 = vmul.f32 %v52_v54, %v51_v53  ;;  %p612_p0 = scmp.ne.s32.totalorder %s513_s16, %s611_s17  ;;  %p616_p1 = scmp.lt.s32.totalorder %s513_s16, %s513_s16 }
  0x11   :  { %p617_p2 = scmp.lt.s32.totalorder %s615_s18, %s611_s17 }
  0x12   :  { %390 = vperm.xlu0 %605, %v387_v17   ;;  %473 = vperm.xlu1 %606, %v468_v18  }
  0x13   :  { %p618_p3 = por %p617_p2, %p616_p1 }
  0x15   :  { %p619_p4 = pnand %p618_p3, %p612_p0 }
  0x16   :  { %485 = vperm.xlu0 %605, %v469_v19  }
  0x85   :  { %v263_v21 = vpop.permute.xlu0 %262  ;;  %v273_v22 = vpop.permute.xlu1 %272 }
  0x89   :  { %v268_v23 = vpop.permute.xlu0 %267  ;;  %v278_v29 = vpop.permute.xlu1 %277 }
  0x8d   :  { %v300_v42 = vpop.permute.xlu1 %299  ;;  %v295_v44 = vpop.permute.xlu0 %294 }
  0x91   :  { %v391_v52 = vpop.permute.xlu0 %390  ;;  %v474_v0 = vpop.permute.xlu1 %473 }
  0x95   :  { %v486_v56 = vpop.permute.xlu0 %485 }
  0x96   :  { %v488_v57 = vmul.f32 %v486_v56, %v470_v55 }
  0x98   :  { %v489_v58 = vrot.slane %v488_v57, 4 }
  0x9a   :  { %v490_v60 = vadd.f32 %v489_v58, %v488_v57 }
  0x9c   :  { %v491_v1 = vrot.slane %v490_v60, 2 }
  0x9e   :  { %v492_v4 = vadd.f32 %v491_v1, %v490_v60 }
  0xa0   :  { %v493_v7 = vrot.slane %v492_v4, 1 }
  0xa2   :  { %v494_v10 = vadd.f32 %v493_v7, %v492_v4 }
  0xdf   :  { %v563_v24 = vpop.f32.mrb[0].mxu0 }
  0xe0   :  { %v281_v25 = vadd.f32 %v563_v24, %v268_v23  ;;  %v241_v26 = vpop.f32.mrb[1].mxu0 }
  0xe1   :  { %v280_v27 = vadd.f32 %v263_v21, %v241_v26 }
  0xe2   :  { %v285_v28 = vmax.f32 %v281_v25, 0.0 }
  0xe3   :  { %v284_v30 = vmax.f32 %v280_v27, 0.0  ;;  %v566_v31 = vpop.f32.mrb[2].mxu0 }
  0xe4   :  { %v283_v32 = vadd.f32 %v566_v31, %v278_v29  ;;  %v251_v33 = vpop.f32.mrb[3].mxu0 }
  0xe5   :  { %v282_v34 = vadd.f32 %v273_v22, %v251_v33  ;;  %v585_v35 = vpack.c.bf16 %v285_v28, %v284_v30 }
  0xe6   :  { %v287_v36 = vmax.f32 %v283_v32, 0.0 }
  0xe7   :  { %v286_v37 = vmax.f32 %v282_v34, 0.0  ;;  %586 = vmatprep.subr.bf16.mxu1 %v585_v35 }
  0xe8   :  { %588 = vmatpush3.bf16.msra.mxu1 %v585_v35 }
  0xe9   :  { %v589_v38 = vpack.c.bf16 %v287_v36, %v286_v37 }
  0xeb   :  { %590 = vmatprep.subr.bf16.mxu1 %v589_v38 }
  0xec   :  { %592 = vmatpush3.bf16.msra.mxu1 %v589_v38 }
  0xed   :  { %593 = vmatprep.subr.bf16.mxu1 %v636_v40 }
  0xef   :  { %576 = vmatmul.mubr.msk.f32.vlgmr.msra.gmra.mrb[0].mxu1 %vm302_vm1, %v289_v39 }
  0xf0   :  { %582 = vmatprep.mubr.msk.f32.mxu1 %vm637_vm2, %v638_v41 }
 0x1c2   :  { %v577_v43 = vpop.f32.mrb[0].mxu1 }
 0x1c3   :  { %v381_v45 = vadd.f32 %v577_v43, %v300_v42  ;;  %v375_v46 = vpop.f32.mrb[1].mxu1 }
 0x1c4   :  { %v376_v47 = vadd.f32 %v375_v46, %v295_v44 }
 0x1c5   :  { %v385_v48 = vmax.f32 %v381_v45, 0.0 }
 0x1c6   :  { %v384_v49 = vmax.f32 %v376_v47, 0.0 }
 0x1c8   :  { %v594_v50 = vpack.c.bf16 %v385_v48, %v384_v49 }
 0x1ca   :  { %595 = vmatpush3.bf16.msra.mxu1 %v594_v50 }
 0x1cd   :  { %583 = vmatmul.mubr.msk.f32.vlgmr.msra.gmra.mrb[2].mxu1 %vm393_vm3, %v386_v51 }
 0x2a0   :  { %v463_v59 = vpop.f32.mrb[2].mxu1 }
 0x2a1   :  { %v464_v61 = vadd.f32 %v463_v59, %v391_v52  ;;  %v584_v62 = vpop.f32.mrb[3].mxu1 }
 0x2a3   :  { %v467_v63 = vmax.f32 %v464_v61, 0.0 }
 0x2a5   :  { %v476_v2 = vmul.f32 %v474_v0, %v467_v63 }
 0x2a7   :  { %v477_v3 = vrot.slane %v476_v2, 4 }
 0x2a9   :  { %v478_v5 = vadd.f32 %v477_v3, %v476_v2 }
 0x2ab   :  { %v479_v6 = vrot.slane %v478_v5, 2 }
 0x2ad   :  { %v480_v8 = vadd.f32 %v479_v6, %v478_v5 }
 0x2af   :  { %v481_v9 = vrot.slane %v480_v8, 1 }
 0x2b1   :  { %v482_v11 = vadd.f32 %v481_v9, %v480_v8 }
 0x2b3   :  { %v495_v13 = vadd.f32 %v494_v10, %v482_v11 }
 0x2b5   :  { %v498_v14 = vadd.f32 %v497_v12, %v495_v13 }
 0x2b7   :  { %v531_v15 = vmul.f32 -1.442695, %v498_v14 }
 0x2b9   :  { %607 = vpow2.f32 %v531_v15 }
 0x2c3   :  { %v608_v16 = vpop.eup %607 }
 0x2c4   :  { %v502_v17 = vadd.f32 1.0, %v608_v16 }
 0x2c6   :  { %609 = vrcp.f32 %v502_v17 }
 0x2d0   :  { %v610_v18 = vpop.eup %609 }
 0x2d1   :  { %505 = vst [vmem:[#allocation3] sm:$0x1] %v610_v18 }
 0x2d2   :  { %622 = shalt.err (!%p619_p4)
}
 0x2d3   :  { %s623_s20 = scalar_lea.hbm %s826_s14, 16 }
 0x2d4   :  { %p624_p5 = scmp.ne.s32.totalorder %s826_s14, %s623_s20  ;;  %p627_p6 = scmp.lt.u32.totalorder %s623_s20, %s826_s14 }
 0x2d6   :  { %p629_p7 = pnand %p627_p6, %p624_p5 }
 0x2d8   :  { %632 = shalt.err (!%p629_p7)
}
 0x2d9   :  { %515 = dma.vmem_to_hbm [thread:$0]  %s513_s16, 16, %s826_s14, [#allocation4]  }
 0x2da   :  { %633 = dma.done.wait [#allocation4], 16  }
 0x2db   :  { %634 = vsyncadd [#allocation4], 4294967280 }
 0x2dc   :  { %519 = vsyncpa [#allocation4], 1 }

</bundles_post_ra>
